<compile_context>
chip_gen: v7x
topology: tpu7x:2x2x1
jax: 0.10.0
libtpu: 0.0.40
codegen_flags: <defaults>
</compile_context>

<pallas_src>
import jax
import jax.numpy as jnp
from jax.experimental import pallas as pl
from jax.experimental.pallas import tpu as pltpu


_EPS = 1e-5
_HID = 48          # true hidden Linear width
_HID_PAD = 128     # lane-dense padded hidden width
_OUT = 3           # number of logits
_OUT_PAD = 128     # lane-dense padded output width


def _round_up(x, m):
    return (x + m - 1) // m * m


# ---------------------------------------------------------------------------
# Pallas kernel: span feature construction + MLP head (BN pre-folded)
# ---------------------------------------------------------------------------
def head_kernel(g_ref, w1_ref, b1_ref, w2_ref, b2_ref, out_ref):
    # g_ref: (5, tile_b, H) bf16 gathered rows:
    #   [span1_start, span1_end, span2_start, span2_end, extra_token]
    H = g_ref.shape[-1]
    s1x = g_ref[0]
    s1y = g_ref[1]
    s2x = g_ref[2]
    s2y = g_ref[3]
    tok = g_ref[4]

    # 'x*y' span combinations, directly in bf16 (bf16-native VPU on v6e/v7x).
    p1 = s1x * s1y
    p2 = s2x * s2y

    # First Linear (BN1 folded into w1/b1, hidden padded to 128 lanes).
    # Instead of concatenating seven width-H chunks (cross-lane relayout +
    # (B,7H) intermediate), split the K axis of W1 with static slices and
    # accumulate partial matmuls in f32 directly on the MXU.
    def mm(x, k):
        return jnp.dot(x, w1_ref[k * H:(k + 1) * H, :],
                       preferred_element_type=jnp.float32)

    h = (mm(s1x, 0) + mm(s1y, 1) + mm(p1, 2)
         + mm(s2x, 3) + mm(s2y, 4) + mm(p2, 5) + mm(tok, 6)
         + b1_ref[...])
    h = jnp.maximum(h, 0.0).astype(jnp.bfloat16)   # ReLU, then bf16 MXU operand

    # Second Linear (BN2 folded into w2/b2).  W2 is zero-padded to
    # (128, 128) and stored bf16 -> single lane-dense bf16 MXU pass and an
    # unmasked 128-lane store; bias added in f32.
    out_ref[...] = (jnp.dot(h, w2_ref[...], preferred_element_type=jnp.float32)
                    + b2_ref[...]).astype(out_ref.dtype)


# ---------------------------------------------------------------------------
# Parameter initialization (mirrors the PyTorch __init__, BN folded)
# ---------------------------------------------------------------------------
def init_head_params(key, hidden_size):
    in_dim = hidden_size * 7
    k1, k2 = jax.random.split(key)

    # nn.init.kaiming_normal_ on the (out, in) PyTorch weight -> std sqrt(2/fan_in);
    # stored transposed (in, out) so the kernel computes x @ W.
    # Biases are explicitly zeroed in the PyTorch __init__.
    w1 = jax.random.normal(k1, (in_dim, _HID), jnp.float32) * jnp.sqrt(2.0 / in_dim)
    b1 = jnp.zeros((_HID,), jnp.float32)
    w2 = jax.random.normal(k2, (_HID, _OUT), jnp.float32) * jnp.sqrt(2.0 / _HID)
    b2 = jnp.zeros((_OUT,), jnp.float32)

    # Eval-mode BatchNorm1d (gamma=1, beta=0, running mean=0, var=1) is a fixed
    # affine; fold it into the adjacent Linear weights (zero runtime cost).
    # NOTE: if trained weights are loaded, recompute scale/shift from the
    # trained running stats before folding.
    bn1_scale = jnp.full((in_dim,), 1.0, jnp.float32) / jnp.sqrt(1.0 + _EPS)
    bn1_shift = jnp.zeros((in_dim,), jnp.float32)
    bn2_scale = jnp.full((_HID,), 1.0, jnp.float32) / jnp.sqrt(1.0 + _EPS)
    bn2_shift = jnp.zeros((_HID,), jnp.float32)

    w1_eff = w1 * bn1_scale[:, None]
    b1_eff = b1 + bn1_shift @ w1
    w2_eff = w2 * bn2_scale[:, None]
    b2_eff = b2 + bn2_shift @ w2

    # Zero-pad: hidden 48 -> 128 lanes, logits 3 -> 128 lanes.  Padded h
    # columns are exactly 0 (zero W1 cols + zero b1 pad) and hit zero W2 rows,
    # so results are unchanged while every vreg stays lane-dense.
    w1_pad = (jnp.zeros((in_dim, _HID_PAD), jnp.float32)
              .at[:, :_HID].set(w1_eff).astype(jnp.bfloat16))
    b1_pad = jnp.zeros((1, _HID_PAD), jnp.float32).at[:, :_HID].set(b1_eff)
    w2_pad = (jnp.zeros((_HID_PAD, _OUT_PAD), jnp.float32)
              .at[:_HID, :_OUT].set(w2_eff).astype(jnp.bfloat16))
    b2_pad = jnp.zeros((1, _OUT_PAD), jnp.float32).at[:, :_OUT].set(b2_eff)

    return dict(w1=w1_pad, b1=b1_pad, w2=w2_pad, b2=b2_pad)


# ---------------------------------------------------------------------------
# Wrapper: single row-gather (glue) + tiled pallas_call
# ---------------------------------------------------------------------------
def head_forward(bert_outputs, offsets, params):
    B, S, H = bert_outputs.shape
    assert offsets.shape[1] >= 5
    in_dim = 7 * H

    # Single gather of the 5 required rows per batch element -> (5, B, H).
    # Clamp defends against out-of-range offsets (same behavior as XLA gather).
    offs = jnp.clip(offsets[:, :5].astype(jnp.int32), 0, S - 1)
    g = bert_outputs[jnp.arange(B)[None, :], offs.T, :]        # (5, B, H)
    g = g.astype(jnp.bfloat16)

    # Batch tiling: multiples of 16 sublanes (bf16 packing).  The kernel is
    # latency/DMA bound (~0.35 us fixed cost per grid step vs ~tens of ns of
    # MXU work), so use big tiles — but keep >= 2 grid steps whenever possible
    # so v7x's two TensorCores both get work on the "parallel" batch axis.
    Bp16 = _round_up(B, 16)
    if Bp16 >= 32:
        tile_b = min(512, _round_up(Bp16 // 2, 16))
        Bp = _round_up(Bp16, tile_b)
    else:
        tile_b = Bp16
        Bp = Bp16
    if Bp != B:
        g = jnp.pad(g, ((0, 0), (0, Bp - B), (0, 0)))
    grid = (Bp // tile_b,)

    w1, b1, w2, b2 = params["w1"], params["b1"], params["w2"], params["b2"]

    cost = pl.CostEstimate(
        flops=(2 * Bp * in_dim * _HID_PAD       # first Linear (padded)
               + 2 * Bp * _HID_PAD * _OUT_PAD   # second Linear (padded)
               + 4 * Bp * H),                   # two elementwise span products
        transcendentals=0,
        bytes_accessed=(g.size * 2 + w1.size * 2 + w2.size * 2
                        + (b1.size + b2.size) * 4
                        + Bp * _OUT_PAD * 4),
    )

    out = pl.pallas_call(
        head_kernel,
        out_shape=jax.ShapeDtypeStruct((Bp, _OUT_PAD), jnp.float32),
        grid=grid,
        in_specs=[
            pl.BlockSpec((5, tile_b, H), lambda i: (0, i, 0)),        # gathered rows (bf16)
            pl.BlockSpec((in_dim, _HID_PAD), lambda i: (0, 0)),       # W1 (bf16, padded)
            pl.BlockSpec((1, _HID_PAD), lambda i: (0, 0)),            # b1 (f32, padded)
            pl.BlockSpec((_HID_PAD, _OUT_PAD), lambda i: (0, 0)),     # W2 (bf16, padded)
            pl.BlockSpec((1, _OUT_PAD), lambda i: (0, 0)),            # b2 (f32, padded)
        ],
        out_specs=pl.BlockSpec((tile_b, _OUT_PAD), lambda i: (i, 0)),
        compiler_params=pltpu.CompilerParams(
            dimension_semantics=("parallel",)),
        cost_estimate=cost,
    )(g, w1, b1, w2, b2)

    return out[:B, :_OUT]


if __name__ == "__main__":
    B, S, H = 8, 16, 32          # batch, sequence length, bert_hidden_size

    key = jax.random.PRNGKey(0)
    k_x, k_off, k_par = jax.random.split(key, 3)

    bert_outputs = jax.random.normal(k_x, (B, S, H), jnp.float32)
    offsets = jax.random.randint(k_off, (B, 5), 0, S, jnp.int32)
    params = init_head_params(k_par, H)

    out = jax.block_until_ready(head_forward(bert_outputs, offsets, params))
    assert out.shape == (B, 3)
    print("KERNEL_OK")
</pallas_src>

<mosaic_0001>
module attributes {stable_mosaic.version = 11 : i64} {
  func.func @head_kernel(%arg0: i32, %arg1: memref<5x16x32xbf16, #tpu.memory_space<vmem>>, %arg2: memref<224x128xbf16, #tpu.memory_space<vmem>>, %arg3: memref<1x128xf32, #tpu.memory_space<vmem>>, %arg4: memref<128x128xbf16, #tpu.memory_space<vmem>>, %arg5: memref<1x128xf32, #tpu.memory_space<vmem>>, %arg6: memref<16x128xf32, #tpu.memory_space<vmem>>) attributes {dimension_semantics = [#tpu.dimension_semantics<parallel>], iteration_bounds = array<i64: 1>, scalar_prefetch = 0 : i64, scratch_operands = 0 : i64, tpu.core_type = #tpu.core_type<tc>, window_params = [{transform_indices = @transform_0, window_bounds = array<i64: 5, 16, 32>}, {pipeline_mode = #tpu.pipeline_mode<synchronous>, transform_indices = @transform_1, window_bounds = array<i64: 224, 128>}, {pipeline_mode = #tpu.pipeline_mode<synchronous>, transform_indices = @transform_2, window_bounds = array<i64: 1, 128>}, {pipeline_mode = #tpu.pipeline_mode<synchronous>, transform_indices = @transform_3, window_bounds = array<i64: 128, 128>}, {pipeline_mode = #tpu.pipeline_mode<synchronous>, transform_indices = @transform_4, window_bounds = array<i64: 1, 128>}, {transform_indices = @transform_5, window_bounds = array<i64: 16, 128>}]} {
    %c0 = arith.constant 0 : index
    %c0_0 = arith.constant 0 : index
    %c0_1 = arith.constant 0 : index
    %0 = vector.load %arg1[%c0, %c0_0, %c0_1] : memref<5x16x32xbf16, #tpu.memory_space<vmem>>, vector<1x16x32xbf16>
    %1 = vector.shape_cast %0 : vector<1x16x32xbf16> to vector<16x32xbf16>
    %c1 = arith.constant 1 : index
    %c0_2 = arith.constant 0 : index
    %c0_3 = arith.constant 0 : index
    %2 = vector.load %arg1[%c1, %c0_2, %c0_3] : memref<5x16x32xbf16, #tpu.memory_space<vmem>>, vector<1x16x32xbf16>
    %3 = vector.shape_cast %2 : vector<1x16x32xbf16> to vector<16x32xbf16>
    %c2 = arith.constant 2 : index
    %c0_4 = arith.constant 0 : index
    %c0_5 = arith.constant 0 : index
    %4 = vector.load %arg1[%c2, %c0_4, %c0_5] : memref<5x16x32xbf16, #tpu.memory_space<vmem>>, vector<1x16x32xbf16>
    %5 = vector.shape_cast %4 : vector<1x16x32xbf16> to vector<16x32xbf16>
    %c3 = arith.constant 3 : index
    %c0_6 = arith.constant 0 : index
    %c0_7 = arith.constant 0 : index
    %6 = vector.load %arg1[%c3, %c0_6, %c0_7] : memref<5x16x32xbf16, #tpu.memory_space<vmem>>, vector<1x16x32xbf16>
    %7 = vector.shape_cast %6 : vector<1x16x32xbf16> to vector<16x32xbf16>
    %c4 = arith.constant 4 : index
    %c0_8 = arith.constant 0 : index
    %c0_9 = arith.constant 0 : index
    %8 = vector.load %arg1[%c4, %c0_8, %c0_9] : memref<5x16x32xbf16, #tpu.memory_space<vmem>>, vector<1x16x32xbf16>
    %9 = vector.shape_cast %8 : vector<1x16x32xbf16> to vector<16x32xbf16>
    %10 = arith.mulf %1, %3 : vector<16x32xbf16>
    %11 = arith.mulf %5, %7 : vector<16x32xbf16>
    %c0_10 = arith.constant 0 : index
    %c0_11 = arith.constant 0 : index
    %12 = vector.load %arg2[%c0_10, %c0_11] : memref<224x128xbf16, #tpu.memory_space<vmem>>, vector<32x128xbf16>
    %cst = arith.constant dense<0.000000e+00> : vector<16x128xf32>
    %13 = tpu.matmul %1, %12, %cst {dimension_numbers = #tpu.dot_dimension_numbers<[1], [0], [0], [1], [0, 0, 1, 1], [], []>} : vector<16x32xbf16>, vector<32x128xbf16>, vector<16x128xf32> -> vector<16x128xf32>
    %c32 = arith.constant 32 : index
    %c0_12 = arith.constant 0 : index
    %14 = vector.load %arg2[%c32, %c0_12] : memref<224x128xbf16, #tpu.memory_space<vmem>>, vector<32x128xbf16>
    %cst_13 = arith.constant dense<0.000000e+00> : vector<16x128xf32>
    %15 = tpu.matmul %3, %14, %cst_13 {dimension_numbers = #tpu.dot_dimension_numbers<[1], [0], [0], [1], [0, 0, 1, 1], [], []>} : vector<16x32xbf16>, vector<32x128xbf16>, vector<16x128xf32> -> vector<16x128xf32>
    %16 = arith.addf %13, %15 : vector<16x128xf32>
    %c64 = arith.constant 64 : index
    %c0_14 = arith.constant 0 : index
    %17 = vector.load %arg2[%c64, %c0_14] : memref<224x128xbf16, #tpu.memory_space<vmem>>, vector<32x128xbf16>
    %cst_15 = arith.constant dense<0.000000e+00> : vector<16x128xf32>
    %18 = tpu.matmul %10, %17, %cst_15 {dimension_numbers = #tpu.dot_dimension_numbers<[1], [0], [0], [1], [0, 0, 1, 1], [], []>} : vector<16x32xbf16>, vector<32x128xbf16>, vector<16x128xf32> -> vector<16x128xf32>
    %19 = arith.addf %16, %18 : vector<16x128xf32>
    %c96 = arith.constant 96 : index
    %c0_16 = arith.constant 0 : index
    %20 = vector.load %arg2[%c96, %c0_16] : memref<224x128xbf16, #tpu.memory_space<vmem>>, vector<32x128xbf16>
    %cst_17 = arith.constant dense<0.000000e+00> : vector<16x128xf32>
    %21 = tpu.matmul %5, %20, %cst_17 {dimension_numbers = #tpu.dot_dimension_numbers<[1], [0], [0], [1], [0, 0, 1, 1], [], []>} : vector<16x32xbf16>, vector<32x128xbf16>, vector<16x128xf32> -> vector<16x128xf32>
    %22 = arith.addf %19, %21 : vector<16x128xf32>
    %c128 = arith.constant 128 : index
    %c0_18 = arith.constant 0 : index
    %23 = vector.load %arg2[%c128, %c0_18] : memref<224x128xbf16, #tpu.memory_space<vmem>>, vector<32x128xbf16>
    %cst_19 = arith.constant dense<0.000000e+00> : vector<16x128xf32>
    %24 = tpu.matmul %7, %23, %cst_19 {dimension_numbers = #tpu.dot_dimension_numbers<[1], [0], [0], [1], [0, 0, 1, 1], [], []>} : vector<16x32xbf16>, vector<32x128xbf16>, vector<16x128xf32> -> vector<16x128xf32>
    %25 = arith.addf %22, %24 : vector<16x128xf32>
    %c160 = arith.constant 160 : index
    %c0_20 = arith.constant 0 : index
    %26 = vector.load %arg2[%c160, %c0_20] : memref<224x128xbf16, #tpu.memory_space<vmem>>, vector<32x128xbf16>
    %cst_21 = arith.constant dense<0.000000e+00> : vector<16x128xf32>
    %27 = tpu.matmul %11, %26, %cst_21 {dimension_numbers = #tpu.dot_dimension_numbers<[1], [0], [0], [1], [0, 0, 1, 1], [], []>} : vector<16x32xbf16>, vector<32x128xbf16>, vector<16x128xf32> -> vector<16x128xf32>
    %28 = arith.addf %25, %27 : vector<16x128xf32>
    %c192 = arith.constant 192 : index
    %c0_22 = arith.constant 0 : index
    %29 = vector.load %arg2[%c192, %c0_22] : memref<224x128xbf16, #tpu.memory_space<vmem>>, vector<32x128xbf16>
    %cst_23 = arith.constant dense<0.000000e+00> : vector<16x128xf32>
    %30 = tpu.matmul %9, %29, %cst_23 {dimension_numbers = #tpu.dot_dimension_numbers<[1], [0], [0], [1], [0, 0, 1, 1], [], []>} : vector<16x32xbf16>, vector<32x128xbf16>, vector<16x128xf32> -> vector<16x128xf32>
    %31 = arith.addf %28, %30 : vector<16x128xf32>
    %c0_24 = arith.constant 0 : index
    %c0_25 = arith.constant 0 : index
    %32 = vector.load %arg3[%c0_24, %c0_25] : memref<1x128xf32, #tpu.memory_space<vmem>>, vector<1x128xf32>
    %33 = vector.broadcast %32 : vector<1x128xf32> to vector<16x128xf32>
    %34 = arith.addf %31, %33 : vector<16x128xf32>
    %cst_26 = arith.constant 0.000000e+00 : f32
    %35 = vector.broadcast %cst_26 : f32 to vector<16x128xf32>
    %36 = arith.maximumf %34, %35 : vector<16x128xf32>
    %37 = arith.truncf %36 : vector<16x128xf32> to vector<16x128xbf16>
    %c0_27 = arith.constant 0 : index
    %c0_28 = arith.constant 0 : index
    %38 = vector.load %arg4[%c0_27, %c0_28] : memref<128x128xbf16, #tpu.memory_space<vmem>>, vector<128x128xbf16>
    %cst_29 = arith.constant dense<0.000000e+00> : vector<16x128xf32>
    %39 = tpu.matmul %37, %38, %cst_29 {dimension_numbers = #tpu.dot_dimension_numbers<[1], [0], [0], [1], [0, 0, 1, 1], [], []>} : vector<16x128xbf16>, vector<128x128xbf16>, vector<16x128xf32> -> vector<16x128xf32>
    %c0_30 = arith.constant 0 : index
    %c0_31 = arith.constant 0 : index
    %40 = vector.load %arg5[%c0_30, %c0_31] : memref<1x128xf32, #tpu.memory_space<vmem>>, vector<1x128xf32>
    %41 = vector.broadcast %40 : vector<1x128xf32> to vector<16x128xf32>
    %42 = arith.addf %39, %41 : vector<16x128xf32>
    %c0_32 = arith.constant 0 : index
    %c0_33 = arith.constant 0 : index
    %43 = vector.load %arg6[%c0_32, %c0_33] : memref<16x128xf32, #tpu.memory_space<vmem>>, vector<16x128xf32>
    tpu.vector_store %arg6[%c0_32, %c0_33], %42 {strides = array<i32>} : memref<16x128xf32, #tpu.memory_space<vmem>>, vector<16x128xf32>,
    return
  }
  func.func @transform_0(%arg0: i32) -> (i32, i32, i32) {
    %c0_i32 = arith.constant 0 : i32
    %c0_i32_0 = arith.constant 0 : i32
    %c0_i32_1 = arith.constant 0 : i32
    return %c0_i32, %arg0, %c0_i32_0 : i32, i32, i32
  }
  func.func @transform_1(%arg0: i32) -> (i32, i32) {
    %c0_i32 = arith.constant 0 : i32
    %c0_i32_0 = arith.constant 0 : i32
    %c0_i32_1 = arith.constant 0 : i32
    return %c0_i32, %c0_i32_0 : i32, i32
  }
  func.func @transform_2(%arg0: i32) -> (i32, i32) {
    %c0_i32 = arith.constant 0 : i32
    %c0_i32_0 = arith.constant 0 : i32
    %c0_i32_1 = arith.constant 0 : i32
    return %c0_i32, %c0_i32_0 : i32, i32
  }
  func.func @transform_3(%arg0: i32) -> (i32, i32) {
    %c0_i32 = arith.constant 0 : i32
    %c0_i32_0 = arith.constant 0 : i32
    %c0_i32_1 = arith.constant 0 : i32
    return %c0_i32, %c0_i32_0 : i32, i32
  }
  func.func @transform_4(%arg0: i32) -> (i32, i32) {
    %c0_i32 = arith.constant 0 : i32
    %c0_i32_0 = arith.constant 0 : i32
    %c0_i32_1 = arith.constant 0 : i32
    return %c0_i32, %c0_i32_0 : i32, i32
  }
  func.func @transform_5(%arg0: i32) -> (i32, i32) {
    %c0_i32 = arith.constant 0 : i32
    %c0_i32_0 = arith.constant 0 : i32
    return %arg0, %c0_i32 : i32, i32
  }
}

</mosaic_0001>

<bundles_post_ra>
// kernel: tpu_custom_call.1
= control target key start
LH: loop header
LB: loop body
LE: loop exit
PB: predicated region body
PF: predicated region fallthrough
CT: control target
= control target key end

     0   :  { %10 = vsyncpa [#allocation3], 0  ;;  %s1121_s0 = inlined_call_operand.hbm [shape: bf16[5,16,32], index: 0, kind: input, shape index: {}]   ;;  %s1122_s1 = inlined_call_operand.hbm [shape: bf16[224,128], index: 1, kind: input, shape index: {}]   ;;  %s1123_s2 = inlined_call_operand.vmem [shape: f32[1,128], index: 2, kind: input, shape index: {}]   ;;  %s1124_s3 = inlined_call_operand.hbm [shape: bf16[128,128], index: 3, kind: input, shape index: {}]   ;;  %s1125_s4 = inlined_call_operand.vmem [shape: f32[1,128], index: 4, kind: input, shape index: {}]   ;;  %s1126_s5 = inlined_call_operand.hbm [shape: f32[16,128], index: 5, kind: output, shape index: {}]  }
   0x1   :  { %11 = vsyncpa [#allocation6], 0 }
   0x2   :  { %12 = vsyncpa [#allocation4], 0  ;;  %s966_s18 = smov [#allocation5]   ;;  %s967_s20 = smov [#allocation2]  }
   0x3   :  { %s30_s19 = sshll.u32 %s966_s18, 4  ;;  %s18_s21 = sshll.u32 %s967_s20, 4  ;;  %s31_s19 = int_to_ptr.vmem [resolvable:$true] %s30_s19  ;;  %s1006_s21 = int_to_ptr.vmem [resolvable:$true] %s18_s21 }
   0x4   :  { %s872_s24 = scalar_lea.hbm %s1122_s1, 1792 }
   0x5   :  { %p873_p0 = scmp.ne.s32.totalorder %s1122_s1, %s872_s24  ;;  %p876_p1 = scmp.lt.u32.totalorder %s872_s24, %s1122_s1 }
   0x7   :  { %p878_p2 = pnand %p876_p1, %p873_p0 }
   0x9   :  { %881 = shalt.err (!%p878_p2)
}
   0xa   :  { %s882_s29 = scalar_lea.vmem %s31_s19, 1792  ;;  %p887_p4 = scmp.lt.s32.totalorder %s31_s19, %s31_s19 }
   0xb   :  { %p883_p3 = scmp.ne.s32.totalorder %s31_s19, %s882_s29  ;;  %p888_p5 = scmp.lt.s32.totalorder %s882_s29, %s882_s29 }
   0xd   :  { %p889_p6 = por %p888_p5, %p887_p4 }
   0xf   :  { %p890_p7 = pnand %p889_p6, %p883_p3 }
  0x11   :  { %893 = shalt.err (!%p890_p7)
}
  0x12   :  { %s968_s30 = smov 64   ;;  %s969_s6 = smov 4  }
  0x13   :  { %36 = dma.hbm_to_vmem [thread:$0]  %s1122_s1, 1792, %s31_s19, [#allocation6], %s968_s30, %s968_s30, %s969_s6  }
  0x14   :  { %s894_s11 = scalar_lea.hbm %s1121_s0, 640 }
  0x15   :  { %p895_p8 = scmp.ne.s32.totalorder %s1121_s0, %s894_s11  ;;  %p898_p9 = scmp.lt.u32.totalorder %s894_s11, %s1121_s0 }
  0x17   :  { %p900_p10 = pnand %p898_p9, %p895_p8 }
  0x19   :  { %903 = shalt.err (!%p900_p10)
}
  0x1a   :  { %s904_s16 = scalar_lea.vmem %s1006_s21, 640  ;;  %p909_p12 = scmp.lt.s32.totalorder %s1006_s21, %s1006_s21 }
  0x1b   :  { %p905_p11 = scmp.ne.s32.totalorder %s1006_s21, %s904_s16  ;;  %p910_p13 = scmp.lt.s32.totalorder %s904_s16, %s904_s16 }
  0x1d   :  { %p911_p0 = por %p910_p13, %p909_p12 }
  0x1f   :  { %p912_p1 = pnand %p911_p0, %p905_p11 }
  0x21   :  { %915 = shalt.err (!%p912_p1)
}
  0x22   :  { %24 = dma.hbm_to_vmem [thread:$0]  %s1121_s0, 640, %s1006_s21, [#allocation3], %s968_s30, %s968_s30, %s969_s6  }
  0x23   :  { %s970_s18 = smov [#allocation7]   ;;  %s916_s23 = scalar_lea.hbm %s1124_s3, 1024 }
  0x24   :  { %s44_s19 = sshll.u32 %s970_s18, 4  ;;  %p917_p2 = scmp.ne.s32.totalorder %s1124_s3, %s916_s23  ;;  %s45_s19 = int_to_ptr.vmem [resolvable:$true] %s44_s19 }
  0x25   :  { %p920_p3 = scmp.lt.u32.totalorder %s916_s23, %s1124_s3 }
  0x27   :  { %p922_p4 = pnand %p920_p3, %p917_p2 }
  0x29   :  { %925 = shalt.err (!%p922_p4)
}
  0x2a   :  { %s926_s28 = scalar_lea.vmem %s45_s19, 1024  ;;  %p931_p6 = scmp.lt.s32.totalorder %s45_s19, %s45_s19 }
  0x2b   :  { %p927_p5 = scmp.ne.s32.totalorder %s45_s19, %s926_s28  ;;  %p932_p7 = scmp.lt.s32.totalorder %s926_s28, %s926_s28 }
  0x2d   :  { %p933_p8 = por %p932_p7, %p931_p6 }
  0x2f   :  { %p934_p9 = pnand %p933_p8, %p927_p5 }
  0x31   :  { %937 = shalt.err (!%p934_p9)
}
  0x32   :  { %50 = dma.hbm_to_vmem [thread:$0]  %s1124_s3, 1024, %s45_s19, [#allocation6], %s968_s30, %s968_s30, %s969_s6  }
  0x33   :  { %960 = dma.done.wait [#allocation3], 640  }
  0x34   :  { %961 = vsyncadd [#allocation3], 4294966656 }
  0x35   :  { %962 = dma.done.wait [#allocation6], 2816  }
  0x36   :  { %963 = vsyncadd [#allocation6], 4294964480  ;;  %v971_v0 = vmov 0.0   ;;  %vm972_vm0 = vmmov 0   ;;  %v845_v1 = vld [vmem:[#allocation5 + $0x10] sm:$0xff]   ;;  %v846_v2 = vld [vmem:[#allocation5 + $0x18] sm:$0xff]  }
  0x37   :  { %759 = vmatprep.subr.bf16.mxu0 %v971_v0  ;;  %763 = vmatprep.mubr.msk.bf16.mxu0 %vm972_vm0, %v971_v0  ;;  %v66_v3 = vld [vmem:[#allocation2 + $0x8] sm:$0xf]  ;;  %v67_v4 = vld [vmem:[#allocation2 + $0xc] sm:$0xf]  ;;  %vm106_vm1 = vcmask 261120   ;;  %v852_v7 = vld [vmem:[#allocation5 + $0x30] sm:$0xff]  }
  0x38   :  { %783 = vmatprep.subr.bf16.mxu1 %v971_v0  ;;  %787 = vmatprep.mubr.msk.bf16.mxu1 %vm972_vm0, %v971_v0  ;;  %v691_v5 = vcombine.low %v66_v3, %v67_v4  ;;  %v849_v6 = vld [vmem:[#allocation5] sm:$0xff]   ;;  %v63_v8 = vld [vmem:[#allocation2] sm:$0xf]  ;;  %v64_v9 = vld [vmem:[#allocation2 + $0x4] sm:$0xf]  ;;  %s973_s7 = smov [#allocation8]  }
  0x39   :  { %760 = vmatpush3.bf16.msra.mxu0 %v845_v1  ;;  %784 = vmatpush3.bf16.msra.mxu1 %v852_v7  ;;  %v854_v10 = vld [vmem:[#allocation5 + $0x38] sm:$0xff]   ;;  %v850_v11 = vld [vmem:[#allocation5 + $0x8] sm:$0xff]   ;;  %v72_v14 = vld [vmem:[#allocation2 + $0x18] sm:$0xf]  ;;  %v695_v17 = vcombine.low %v63_v8, %v64_v9  ;;  %v77_v23 = vmul.bf16 %v66_v3, %v63_v8  ;;  %v78_v24 = vmul.bf16 %v67_v4, %v64_v9  ;;  %s678_s8 = sshll.u32 %s973_s7, 4  ;;  %s679_s8 = int_to_ptr.vmem [resolvable:$true] %s678_s8 }
  0x3a   :  { %761 = vmatprep.subr.bf16.mxu0 %v971_v0  ;;  %v69_v12 = vld [vmem:[#allocation2 + $0x10] sm:$0xf]  ;;  %v70_v13 = vld [vmem:[#allocation2 + $0x14] sm:$0xf]  ;;  %785 = vmatprep.subr.bf16.mxu1 %v971_v0  ;;  %v73_v15 = vld [vmem:[#allocation2 + $0x1c] sm:$0xf]  ;;  %p943_p11 = scmp.lt.s32.totalorder %s679_s8, %s679_s8 }
  0x3b   :  { %v703_v16 = vcombine.low %v69_v12, %v70_v13  ;;  %v858_v18 = vld [vmem:[#allocation5 + $0x50] sm:$0xff]   ;;  %v851_v19 = vld [vmem:[#allocation5 + $0x20] sm:$0xff]   ;;  %v853_v20 = vld [vmem:[#allocation5 + $0x28] sm:$0xff]   ;;  %v79_v21 = vmul.bf16 %v72_v14, %v69_v12  ;;  %v80_v22 = vmul.bf16 %v73_v15, %v70_v13  ;;  %v699_v28 = vcombine.low %v77_v23, %v78_v24 }
  0x3c   :  { %v860_v25 = vld [vmem:[#allocation5 + $0x58] sm:$0xff]   ;;  %v855_v26 = vld [vmem:[#allocation5 + $0x40] sm:$0xff]   ;;  %v859_v29 = vld [vmem:[#allocation5 + $0x48] sm:$0xff]   ;;  %v707_v30 = vcombine.low %v72_v14, %v73_v15 }
  0x3d   :  { %762 = vmatpush3.bf16.msra.mxu0 %v846_v2  ;;  %786 = vmatpush3.bf16.msra.mxu1 %v854_v10  ;;  %v711_v27 = vcombine.low %v79_v21, %v80_v22  ;;  %v861_v31 = vld [vmem:[#allocation5 + $0x60] sm:$0xff]   ;;  %v862_v32 = vld [vmem:[#allocation5 + $0x68] sm:$0xff]   ;;  %v863_v33 = vld [vmem:[#allocation2 + $0x20] sm:$0xff]  }
  0x3e   :  { %767 = vmatprep.subr.bf16.mxu0 %v971_v0  ;;  %799 = vmatprep.subr.bf16.mxu1 %v971_v0  ;;  %v864_v34 = vld [vmem:[#allocation7] sm:$0xff]   ;;  %v865_v35 = vld [vmem:[#allocation7 + $0x8] sm:$0xff]   ;;  %v866_v36 = vld [vmem:[#allocation7 + $0x10] sm:$0xff]  }
  0x3f   :  { %v867_v37 = vld [vmem:[#allocation7 + $0x18] sm:$0xff]   ;;  %v868_v38 = vld [vmem:[#allocation7 + $0x20] sm:$0xff]   ;;  %v869_v39 = vld [vmem:[#allocation7 + $0x28] sm:$0xff]  }
  0x40   :  { %764 = vmatmul.mubr.msk.bf16.vlgmr.msra.gmra.mrb[0].mxu0 %vm106_vm1, %v691_v5  ;;  %788 = vmatmul.mubr.msk.bf16.vlgmr.msra.gmra.mrb[0].mxu1 %vm106_vm1, %v703_v16  ;;  %v870_v40 = vld [vmem:[#allocation7 + $0x30] sm:$0xff]   ;;  %v871_v41 = vld [vmem:[#allocation7 + $0x38] sm:$0xff]   ;;  %v719_v13 = vld [vmem:[%s1123_s2] ss:$0 sm:$0xff]  ;;  %s938_s2 = scalar_lea.vmem %s679_s8, 256 }
  0x41   :  { %768 = vmatpush3.bf16.msra.mxu0 %v849_v6  ;;  %771 = vmatprep.mubr.msk.bf16.mxu0 %vm972_vm0, %v971_v0  ;;  %v720_v24 = vld [vmem:[%s1125_s4] ss:$0 sm:$0xff]  ;;  %p939_p10 = scmp.ne.s32.totalorder %s679_s8, %s938_s2  ;;  %p944_p12 = scmp.lt.s32.totalorder %s938_s2, %s938_s2 }
  0x42   :  { %769 = vmatprep.subr.bf16.mxu0 %v971_v0  ;;  %800 = vmatpush3.bf16.msra.mxu1 %v858_v18 }
  0x43   :  { %801 = vmatprep.subr.bf16.mxu1 %v971_v0  ;;  %803 = vmatprep.mubr.msk.bf16.mxu1 %vm972_vm0, %v971_v0  ;;  %p945_p13 = por %p944_p12, %p943_p11 }
  0x45   :  { %770 = vmatpush3.bf16.msra.mxu0 %v850_v11  ;;  %p946_p0 = pnand %p945_p13, %p939_p10 }
  0x46   :  { %775 = vmatprep.subr.bf16.mxu0 %v971_v0  ;;  %802 = vmatpush3.bf16.msra.mxu1 %v860_v25 }
  0x47   :  { %815 = vmatprep.subr.bf16.mxu1 %v971_v0 }
  0x48   :  { %772 = vmatmul.mubr.msk.bf16.vlgmr.msra.gmra.mrb[4].mxu0 %vm106_vm1, %v695_v17 }
  0x49   :  { %776 = vmatpush3.bf16.msra.mxu0 %v851_v19  ;;  %779 = vmatprep.mubr.msk.bf16.mxu0 %vm972_vm0, %v971_v0 }
  0x4a   :  { %777 = vmatprep.subr.bf16.mxu0 %v971_v0  ;;  %804 = vmatmul.mubr.msk.bf16.vlgmr.msra.gmra.mrb[4].mxu1 %vm106_vm1, %v711_v27 }
  0x4b   :  { %831 = vmatprep.mubr.msk.bf16.mxu1 %vm972_vm0, %v971_v0  ;;  %816 = vmatpush3.bf16.msra.mxu1 %v864_v34 }
  0x4c   :  { %817 = vmatprep.subr.bf16.mxu1 %v971_v0 }
  0x4d   :  { %778 = vmatpush3.bf16.msra.mxu0 %v853_v20 }
  0x4e   :  { %791 = vmatprep.subr.bf16.mxu0 %v971_v0 }
  0x4f   :  { %818 = vmatpush3.bf16.msra.mxu1 %v865_v35 }
  0x50   :  { %780 = vmatmul.mubr.msk.bf16.vlgmr.msra.gmra.mrb[8].mxu0 %vm106_vm1, %v699_v28  ;;  %819 = vmatprep.subr.bf16.mxu1 %v971_v0 }
  0x51   :  { %792 = vmatpush3.bf16.msra.mxu0 %v855_v26  ;;  %795 = vmatprep.mubr.msk.bf16.mxu0 %vm972_vm0, %v971_v0 }
  0x52   :  { %793 = vmatprep.subr.bf16.mxu0 %v971_v0 }
  0x53   :  { %820 = vmatpush3.bf16.msra.mxu1 %v866_v36 }
  0x54   :  { %821 = vmatprep.subr.bf16.mxu1 %v971_v0 }
  0x55   :  { %794 = vmatpush3.bf16.msra.mxu0 %v859_v29 }
  0x56   :  { %807 = vmatprep.subr.bf16.mxu0 %v971_v0 }
  0x57   :  { %822 = vmatpush3.bf16.msra.mxu1 %v867_v37 }
  0x58   :  { %796 = vmatmul.mubr.msk.bf16.vlgmr.msra.gmra.mrb[12].mxu0 %vm106_vm1, %v707_v30  ;;  %823 = vmatprep.subr.bf16.mxu1 %v971_v0 }
  0x59   :  { %808 = vmatpush3.bf16.msra.mxu0 %v861_v31  ;;  %811 = vmatprep.mubr.msk.bf16.mxu0 %vm972_vm0, %v971_v0 }
  0x5a   :  { %809 = vmatprep.subr.bf16.mxu0 %v971_v0 }
  0x5b   :  { %824 = vmatpush3.bf16.msra.mxu1 %v868_v38 }
  0x5c   :  { %825 = vmatprep.subr.bf16.mxu1 %v971_v0 }
  0x5d   :  { %810 = vmatpush3.bf16.msra.mxu0 %v862_v32 }
  0x5f   :  { %826 = vmatpush3.bf16.msra.mxu1 %v869_v39 }
  0x60   :  { %812 = vmatmul.mubr.msk.bf16.vlgmr.msra.gmra.mrb[16].mxu0 %vm106_vm1, %v863_v33  ;;  %827 = vmatprep.subr.bf16.mxu1 %v971_v0 }
  0x63   :  { %828 = vmatpush3.bf16.msra.mxu1 %v870_v40 }
  0x64   :  { %829 = vmatprep.subr.bf16.mxu1 %v971_v0 }
  0x67   :  { %830 = vmatpush3.bf16.msra.mxu1 %v871_v41 }
 0x113   :  { %v144_v42 = vpop.f32.mrb[0].mxu0  ;;  %v337_v46 = vpop.f32.mrb[0].mxu1 }
 0x114   :  { %v765_v43 = vpop.f32.mrb[1].mxu0  ;;  %v789_v48 = vpop.f32.mrb[1].mxu1 }
 0x115   :  { %v147_v44 = vpop.f32.mrb[2].mxu0  ;;  %v340_v51 = vpop.f32.mrb[2].mxu1 }
 0x116   :  { %v766_v45 = vpop.f32.mrb[3].mxu0  ;;  %v790_v53 = vpop.f32.mrb[3].mxu1 }
 0x11b   :  { %v205_v47 = vpop.f32.mrb[4].mxu0 }
 0x11c   :  { %v206_v49 = vadd.f32 %v205_v47, %v144_v42  ;;  %v773_v50 = vpop.f32.mrb[5].mxu0 }
 0x11d   :  { %v208_v52 = vpop.f32.mrb[6].mxu0  ;;  %v471_v56 = vpop.f32.mrb[4].mxu1 }
 0x11e   :  { %v209_v54 = vadd.f32 %v208_v52, %v147_v44  ;;  %v774_v55 = vpop.f32.mrb[7].mxu0  ;;  %v805_v58 = vpop.f32.mrb[5].mxu1 }
 0x11f   :  { %v474_v61 = vpop.f32.mrb[6].mxu1 }
 0x120   :  { %v806_v63 = vpop.f32.mrb[7].mxu1 }
 0x123   :  { %v270_v57 = vpop.f32.mrb[8].mxu0 }
 0x124   :  { %v277_v59 = vadd.f32 %v270_v57, %v206_v49  ;;  %v781_v60 = vpop.f32.mrb[9].mxu0 }
 0x125   :  { %v273_v62 = vpop.f32.mrb[10].mxu0 }
 0x126   :  { %v278_v0 = vadd.f32 %v273_v62, %v209_v54  ;;  %v344_v1 = vadd.f32 %v337_v46, %v277_v59  ;;  %v782_v2 = vpop.f32.mrb[11].mxu0 }
 0x128   :  { %v345_v3 = vadd.f32 %v340_v51, %v278_v0 }
 0x12b   :  { %v404_v4 = vpop.f32.mrb[12].mxu0 }
 0x12c   :  { %v411_v5 = vadd.f32 %v404_v4, %v344_v1  ;;  %v797_v6 = vpop.f32.mrb[13].mxu0 }
 0x12d   :  { %v407_v7 = vpop.f32.mrb[14].mxu0 }
 0x12e   :  { %v412_v8 = vadd.f32 %v407_v7, %v345_v3  ;;  %v478_v9 = vadd.f32 %v471_v56, %v411_v5  ;;  %v798_v10 = vpop.f32.mrb[15].mxu0 }
 0x130   :  { %v479_v11 = vadd.f32 %v474_v61, %v412_v8 }
 0x133   :  { %v538_v12 = vpop.f32.mrb[16].mxu0 }
 0x134   :  { %v545_v14 = vadd.f32 %v538_v12, %v478_v9  ;;  %v813_v15 = vpop.f32.mrb[17].mxu0 }
 0x135   :  { %v541_v16 = vpop.f32.mrb[18].mxu0 }
 0x136   :  { %v554_v17 = vadd.f32 %v719_v13, %v545_v14  ;;  %v546_v18 = vadd.f32 %v541_v16, %v479_v11  ;;  %v814_v19 = vpop.f32.mrb[19].mxu0 }
 0x138   :  { %v555_v20 = vadd.f32 %v719_v13, %v546_v18  ;;  %v556_v21 = vmax.f32 %v554_v17, 0.0 }
 0x13a   :  { %v557_v22 = vmax.f32 %v555_v20, 0.0 }
 0x13c   :  { %v558_v23 = vpack.c.bf16 %v557_v22, %v556_v21 }
 0x13e   :  { %832 = vmatmul.mubr.bf16.vlgmr.msra.gmra.mrb[8].mxu1 %v558_v23 }
 0x211   :  { %v664_v25 = vpop.f32.mrb[8].mxu1 }
 0x212   :  { %v665_v26 = vadd.f32 %v720_v24, %v664_v25  ;;  %v833_v27 = vpop.f32.mrb[9].mxu1 }
 0x213   :  { %v667_v28 = vpop.f32.mrb[10].mxu1 }
 0x214   :  { %671 = vst [vmem:[#allocation8] sm:$0xff] %v665_v26  ;;  %v668_v29 = vadd.f32 %v720_v24, %v667_v28  ;;  %v834_v30 = vpop.f32.mrb[11].mxu1 }
 0x216   :  { %672 = vst [vmem:[#allocation8 + $0x8] sm:$0xff] %v668_v29 }
 0x217   :  { %949 = shalt.err (!%p946_p0)
}
 0x218   :  { %s950_s10 = scalar_lea.hbm %s1126_s5, 256 }
 0x219   :  { %p951_p1 = scmp.ne.s32.totalorder %s1126_s5, %s950_s10  ;;  %p954_p2 = scmp.lt.u32.totalorder %s950_s10, %s1126_s5 }
 0x21b   :  { %p956_p3 = pnand %p954_p2, %p951_p1 }
 0x21d   :  { %959 = shalt.err (!%p956_p3)
}
 0x21e   :  { %s974_s15 = smov 128   ;;  %s975_s16 = smov 8  }
 0x21f   :  { %684 = dma.vmem_to_hbm [thread:$0]  %s679_s8, 256, %s1126_s5, [#allocation4], %s974_s15, %s974_s15, %s975_s16  }
 0x220   :  { %964 = dma.done.wait [#allocation4], 256  }
 0x221   :  { %965 = vsyncadd [#allocation4], 4294967040 }
 0x222   :  { %688 = vsyncpa [#allocation3], 1 }
 0x223   :  { %689 = vsyncpa [#allocation6], 1 }
 0x224   :  { %690 = vsyncpa [#allocation4], 1 }

</bundles_post_ra>
